<compile_context>
chip_gen: v5e
topology: v5e:2x2
jax: 0.10.0
libtpu: 0.0.40
codegen_flags: <defaults>
</compile_context>

<pallas_src>
import functools

import jax
import jax.numpy as jnp
from jax.experimental import pallas as pl
from jax.experimental.pallas import tpu as pltpu

NPOSE = 24 * 6                    # 144
NSHAPE = 10
NCAM = 3
STATE_DIM = NPOSE + NSHAPE + NCAM # 157
STATE_PAD = 256                   # lane-dense padded state width (multiple of 128)


def _cdiv(a, b):
    return (a + b - 1) // b


def _round_up(x, m):
    return _cdiv(x, m) * m


# ----------------------------------------------------------------------------
# Kernel: one row-tile, full IEF loop fused
# ----------------------------------------------------------------------------
def regressor_kernel(x_ref, state0_ref,
                     w1x_ref, w1s_ref, b1_ref,
                     wdec_ref, bdec_ref,
                     state_out_ref, *, n_iter):
    f32, bf16 = jnp.float32, jnp.bfloat16

    # fc1 contribution of the iteration-invariant image feature: computed ONCE
    # per row tile.  x arrives in its producer dtype (f32) and is cast to bf16
    # *after* the DMA, so the wrapper never does an extra HBM pass over x.
    x_bf = x_ref[...].astype(bf16)
    xw = jnp.dot(x_bf, w1x_ref[...], preferred_element_type=f32) + b1_ref[...]

    state = state0_ref[...]            # f32 accumulator (tile_n, 256) = [pose|shape|cam|0-pad]
    w1s = w1s_ref[...]                 # bf16 (256, hidden), zero rows in the padding
    wdec = wdec_ref[...]               # bf16 (hidden, 256), zero cols in the padding
    bdec = jnp.broadcast_to(bdec_ref[...], state.shape)   # hoisted out of the loop (f32)

    # IEF refinement: small static n_iter -> unrolled at trace time.
    # bf16 matmul operands (MXU-native), f32 accumulation + f32 residual state.
    for _ in range(n_iter):
        xc = xw + jnp.dot(state.astype(bf16), w1s, preferred_element_type=f32)
        state = state + jnp.dot(xc.astype(bf16), wdec, preferred_element_type=f32) + bdec

    state_out_ref[...] = state


# ----------------------------------------------------------------------------
# Parameter construction (mirrors the PyTorch __init__ shapes / inits)
# ----------------------------------------------------------------------------
def init_params(key, f_dim, hidden):
    ks = jax.random.split(key, 8)
    in1 = f_dim + STATE_DIM                       # fc1: Linear(f_dim + 144 + 13, hidden)
    b1b = 1.0 / (in1 ** 0.5)
    w1 = jax.random.uniform(ks[0], (in1, hidden), jnp.float32, -b1b, b1b)
    b1 = jax.random.uniform(ks[1], (1, hidden), jnp.float32, -b1b, b1b)

    def dec(kw, kb, out_dim):
        wb = 0.01 * (6.0 / (hidden + out_dim)) ** 0.5   # xavier_uniform, gain=0.01
        bb = 1.0 / (hidden ** 0.5)
        w = jax.random.uniform(kw, (hidden, out_dim), jnp.float32, -wb, wb)
        b = jax.random.uniform(kb, (1, out_dim), jnp.float32, -bb, bb)
        return w, b

    wp, bp = dec(ks[2], ks[3], NPOSE)       # decpose
    wsh, bsh = dec(ks[4], ks[5], NSHAPE)    # decshape
    wc, bc = dec(ks[6], ks[7], NCAM)        # deccam
    # NOTE: the PyTorch module also defines fc2/drop2 but never uses them in forward().

    params = dict(w1=w1, b1=b1, wp=wp, bp=bp, wsh=wsh, bsh=bsh, wc=wc, bc=bc)

    # --- kernel-side fused / padded weights (bf16 for MXU-native matmuls) ----
    w1x = w1[:f_dim]                                              # (f_dim, hidden)
    w1s = jnp.zeros((STATE_PAD, hidden), jnp.float32).at[:STATE_DIM].set(w1[f_dim:])
    wdec = jnp.zeros((hidden, STATE_PAD), jnp.float32)
    wdec = wdec.at[:, :NPOSE].set(wp)
    wdec = wdec.at[:, NPOSE:NPOSE + NSHAPE].set(wsh)
    wdec = wdec.at[:, NPOSE + NSHAPE:STATE_DIM].set(wc)
    bdec = jnp.zeros((1, STATE_PAD), jnp.float32)
    bdec = bdec.at[:, :NPOSE].set(bp)
    bdec = bdec.at[:, NPOSE:NPOSE + NSHAPE].set(bsh)
    bdec = bdec.at[:, NPOSE + NSHAPE:STATE_DIM].set(bc)

    params.update(w1x_bf16=w1x.astype(jnp.bfloat16),
                  w1s_bf16=w1s.astype(jnp.bfloat16),
                  wdec_bf16=wdec.astype(jnp.bfloat16),
                  bdec_pad=bdec)                                  # biases stay f32
    return params


# ----------------------------------------------------------------------------
# Wrapper: packing, row tiling, pallas_call
# ----------------------------------------------------------------------------
def regressor_forward(params, x, init_pose, init_shape, init_cam,
                      n_iter=3, tile_n=512):
    f_dim = x.shape[-1]
    hidden = params['b1'].shape[-1]
    x2 = x.reshape(-1, f_dim)                       # no wrapper-side cast of x
    N = x2.shape[0]
    p0 = init_pose.reshape(-1, NPOSE).astype(jnp.float32)
    s0 = init_shape.reshape(-1, NSHAPE).astype(jnp.float32)
    c0 = init_cam.reshape(-1, NCAM).astype(jnp.float32)

    # Pack pose/shape/cam into one lane-dense, zero-padded state slab (width 256).
    state0 = jnp.concatenate(
        [p0, s0, c0, jnp.zeros((N, STATE_PAD - STATE_DIM), jnp.float32)], axis=-1)

    # Row tiling: no jnp.pad copy of x — grid uses cdiv and Pallas masks the
    # ragged last block.  tile_n multiple of 8 (f32 sublane).  When the whole
    # problem fits one tile, split it in two so v7x's 2 TensorCores both get a
    # grid step via the "parallel" axis.
    tile_n = _round_up(min(tile_n, _round_up(N, 8)), 8)
    if N <= tile_n and N > 8:
        tile_n = _round_up(_cdiv(N, 2), 8)
    grid_n = _cdiv(N, tile_n)

    row = lambda i: (i, 0)
    const = lambda i: (0, 0)
    single = pl.Buffered(1)     # weight blocks never change -> no double-buffering

    rows_eff = grid_n * tile_n
    flops = (2 * rows_eff * f_dim * hidden
             + n_iter * (2 * rows_eff * STATE_PAD * hidden
                         + 2 * rows_eff * hidden * STATE_PAD))
    bytes_accessed = (x2.size * x2.dtype.itemsize + state0.size * 4
                      + params['w1x_bf16'].size * 2
                      + params['w1s_bf16'].size * 2 + params['wdec_bf16'].size * 2
                      + params['b1'].size * 4 + params['bdec_pad'].size * 4
                      + N * STATE_PAD * 4)

    out = pl.pallas_call(
        functools.partial(regressor_kernel, n_iter=n_iter),
        out_shape=jax.ShapeDtypeStruct((N, STATE_PAD), jnp.float32),
        grid=(grid_n,),
        in_specs=[
            pl.BlockSpec((tile_n, f_dim), row),                             # x tile (f32)
            pl.BlockSpec((tile_n, STATE_PAD), row),                         # packed init state
            pl.BlockSpec((f_dim, hidden), const, pipeline_mode=single),     # W1x (bf16, resident)
            pl.BlockSpec((STATE_PAD, hidden), const, pipeline_mode=single), # W1state (bf16, resident)
            pl.BlockSpec((1, hidden), const, pipeline_mode=single),         # b1 (f32)
            pl.BlockSpec((hidden, STATE_PAD), const, pipeline_mode=single), # fused dec W (bf16)
            pl.BlockSpec((1, STATE_PAD), const, pipeline_mode=single),      # fused dec b (f32)
        ],
        out_specs=pl.BlockSpec((tile_n, STATE_PAD), row),
        compiler_params=pltpu.CompilerParams(
            dimension_semantics=("parallel",),
            # static footprint after bf16 weights + single buffering is well
            # under the v7x 64 MiB / per-TC budget for tile_n <= 1024.
            vmem_limit_bytes=48 * 1024 * 1024),
        cost_estimate=pl.CostEstimate(flops=flops, transcendentals=0,
                                      bytes_accessed=bytes_accessed),
    )(x2, state0,
      params['w1x_bf16'], params['w1s_bf16'], params['b1'],
      params['wdec_bf16'], params['bdec_pad'])

    pred_pose = out[:, :NPOSE]
    pred_shape = out[:, NPOSE:NPOSE + NSHAPE]
    pred_cam = out[:, NPOSE + NSHAPE:STATE_DIM]
    return pred_pose, pred_shape, pred_cam


# ----------------------------------------------------------------------------
# Pure-JAX reference mirroring the PyTorch forward loop (f32, unfused)
# ----------------------------------------------------------------------------
def reference_forward(params, x, init_pose, init_shape, init_cam, n_iter=3):
    f_dim = x.shape[-1]
    x2 = x.reshape(-1, f_dim)
    pose = init_pose.reshape(-1, NPOSE)
    shape = init_shape.reshape(-1, NSHAPE)
    cam = init_cam.reshape(-1, NCAM)
    for _ in range(n_iter):
        xc = jnp.concatenate([x2, pose, shape, cam], 1) @ params['w1'] + params['b1']
        pose = xc @ params['wp'] + params['bp'] + pose
        shape = xc @ params['wsh'] + params['bsh'] + shape
        cam = xc @ params['wc'] + params['bc'] + cam
    return pose, shape, cam


if __name__ == "__main__":
    # Small shapes consistent with the module (real model: f_dim=2048, hidden=1024).
    B, T = 2, 4
    f_dim, hidden = 256, 128

    key = jax.random.PRNGKey(0)
    kp, kx, kpo, ksh, kc = jax.random.split(key, 5)
    params = init_params(kp, f_dim, hidden)

    x = jax.random.normal(kx, (B, T, f_dim), jnp.float32)
    # Stand-ins for the smpl_mean_params buffers (real ones come from an npz file).
    init_pose = 0.1 * jax.random.normal(kpo, (B, T, NPOSE), jnp.float32)
    init_shape = 0.1 * jax.random.normal(ksh, (B, T, NSHAPE), jnp.float32)
    init_cam = 0.1 * jax.random.normal(kc, (B, T, NCAM), jnp.float32)

    pose, shape, cam = regressor_forward(params, x, init_pose, init_shape, init_cam, n_iter=3)
    jax.block_until_ready((pose, shape, cam))

    r_pose, r_shape, r_cam = reference_forward(params, x, init_pose, init_shape, init_cam, n_iter=3)
    # bf16 matmul operands (f32 accumulation/state) -> loosened tolerance.
    assert jnp.allclose(pose, r_pose, atol=5e-3, rtol=5e-3), float(jnp.abs(pose - r_pose).max())
    assert jnp.allclose(shape, r_shape, atol=5e-3, rtol=5e-3), float(jnp.abs(shape - r_shape).max())
    assert jnp.allclose(cam, r_cam, atol=5e-3, rtol=5e-3), float(jnp.abs(cam - r_cam).max())

    print("KERNEL_OK")
</pallas_src>

<mosaic_0001>
module attributes {stable_mosaic.version = 11 : i64} {
  func.func @regressor_kernel(%arg0: i32, %arg1: memref<8x256xf32, #tpu.memory_space<vmem>>, %arg2: memref<8x256xf32, #tpu.memory_space<vmem>>, %arg3: memref<256x128xbf16, #tpu.memory_space<vmem>>, %arg4: memref<256x128xbf16, #tpu.memory_space<vmem>>, %arg5: memref<1x128xf32, #tpu.memory_space<vmem>>, %arg6: memref<128x256xbf16, #tpu.memory_space<vmem>>, %arg7: memref<1x256xf32, #tpu.memory_space<vmem>>, %arg8: memref<8x256xf32, #tpu.memory_space<vmem>>) attributes {dimension_semantics = [#tpu.dimension_semantics<parallel>], iteration_bounds = array<i64: 1>, scalar_prefetch = 0 : i64, scratch_operands = 0 : i64, tpu.core_type = #tpu.core_type<tc>, window_params = [{transform_indices = @transform_0, window_bounds = array<i64: 8, 256>}, {transform_indices = @transform_1, window_bounds = array<i64: 8, 256>}, {pipeline_mode = #tpu.pipeline_mode<synchronous>, transform_indices = @transform_2, window_bounds = array<i64: 256, 128>}, {pipeline_mode = #tpu.pipeline_mode<synchronous>, transform_indices = @transform_3, window_bounds = array<i64: 256, 128>}, {pipeline_mode = #tpu.pipeline_mode<synchronous>, transform_indices = @transform_4, window_bounds = array<i64: 1, 128>}, {pipeline_mode = #tpu.pipeline_mode<synchronous>, transform_indices = @transform_5, window_bounds = array<i64: 128, 256>}, {pipeline_mode = #tpu.pipeline_mode<synchronous>, transform_indices = @transform_6, window_bounds = array<i64: 1, 256>}, {transform_indices = @transform_7, window_bounds = array<i64: 8, 256>}]} {
    %c0 = arith.constant 0 : index
    %c0_0 = arith.constant 0 : index
    %0 = vector.load %arg1[%c0, %c0_0] : memref<8x256xf32, #tpu.memory_space<vmem>>, vector<8x256xf32>
    %1 = arith.truncf %0 : vector<8x256xf32> to vector<8x256xbf16>
    %c0_1 = arith.constant 0 : index
    %c0_2 = arith.constant 0 : index
    %2 = vector.load %arg3[%c0_1, %c0_2] : memref<256x128xbf16, #tpu.memory_space<vmem>>, vector<256x128xbf16>
    %cst = arith.constant dense<0.000000e+00> : vector<8x128xf32>
    %3 = tpu.matmul %1, %2, %cst {dimension_numbers = #tpu.dot_dimension_numbers<[1], [0], [0], [1], [0, 0, 1, 1], [], []>} : vector<8x256xbf16>, vector<256x128xbf16>, vector<8x128xf32> -> vector<8x128xf32>
    %c0_3 = arith.constant 0 : index
    %c0_4 = arith.constant 0 : index
    %4 = vector.load %arg5[%c0_3, %c0_4] : memref<1x128xf32, #tpu.memory_space<vmem>>, vector<1x128xf32>
    %5 = vector.broadcast %4 : vector<1x128xf32> to vector<8x128xf32>
    %6 = arith.addf %3, %5 : vector<8x128xf32>
    %c0_5 = arith.constant 0 : index
    %c0_6 = arith.constant 0 : index
    %7 = vector.load %arg2[%c0_5, %c0_6] : memref<8x256xf32, #tpu.memory_space<vmem>>, vector<8x256xf32>
    %c0_7 = arith.constant 0 : index
    %c0_8 = arith.constant 0 : index
    %8 = vector.load %arg4[%c0_7, %c0_8] : memref<256x128xbf16, #tpu.memory_space<vmem>>, vector<256x128xbf16>
    %c0_9 = arith.constant 0 : index
    %c0_10 = arith.constant 0 : index
    %9 = vector.load %arg6[%c0_9, %c0_10] : memref<128x256xbf16, #tpu.memory_space<vmem>>, vector<128x256xbf16>
    %c0_11 = arith.constant 0 : index
    %c0_12 = arith.constant 0 : index
    %10 = vector.load %arg7[%c0_11, %c0_12] : memref<1x256xf32, #tpu.memory_space<vmem>>, vector<1x256xf32>
    %11 = vector.shape_cast %10 : vector<1x256xf32> to vector<1x256xf32>
    %12 = vector.broadcast %11 : vector<1x256xf32> to vector<8x256xf32>
    %13 = arith.truncf %7 : vector<8x256xf32> to vector<8x256xbf16>
    %cst_13 = arith.constant dense<0.000000e+00> : vector<8x128xf32>
    %14 = tpu.matmul %13, %8, %cst_13 {dimension_numbers = #tpu.dot_dimension_numbers<[1], [0], [0], [1], [0, 0, 1, 1], [], []>} : vector<8x256xbf16>, vector<256x128xbf16>, vector<8x128xf32> -> vector<8x128xf32>
    %15 = arith.addf %6, %14 : vector<8x128xf32>
    %16 = arith.truncf %15 : vector<8x128xf32> to vector<8x128xbf16>
    %cst_14 = arith.constant dense<0.000000e+00> : vector<8x256xf32>
    %17 = tpu.matmul %16, %9, %cst_14 {dimension_numbers = #tpu.dot_dimension_numbers<[1], [0], [0], [1], [0, 0, 1, 1], [], []>} : vector<8x128xbf16>, vector<128x256xbf16>, vector<8x256xf32> -> vector<8x256xf32>
    %18 = arith.addf %7, %17 : vector<8x256xf32>
    %19 = arith.addf %18, %12 : vector<8x256xf32>
    %20 = arith.truncf %19 : vector<8x256xf32> to vector<8x256xbf16>
    %cst_15 = arith.constant dense<0.000000e+00> : vector<8x128xf32>
    %21 = tpu.matmul %20, %8, %cst_15 {dimension_numbers = #tpu.dot_dimension_numbers<[1], [0], [0], [1], [0, 0, 1, 1], [], []>} : vector<8x256xbf16>, vector<256x128xbf16>, vector<8x128xf32> -> vector<8x128xf32>
    %22 = arith.addf %6, %21 : vector<8x128xf32>
    %23 = arith.truncf %22 : vector<8x128xf32> to vector<8x128xbf16>
    %cst_16 = arith.constant dense<0.000000e+00> : vector<8x256xf32>
    %24 = tpu.matmul %23, %9, %cst_16 {dimension_numbers = #tpu.dot_dimension_numbers<[1], [0], [0], [1], [0, 0, 1, 1], [], []>} : vector<8x128xbf16>, vector<128x256xbf16>, vector<8x256xf32> -> vector<8x256xf32>
    %25 = arith.addf %19, %24 : vector<8x256xf32>
    %26 = arith.addf %25, %12 : vector<8x256xf32>
    %27 = arith.truncf %26 : vector<8x256xf32> to vector<8x256xbf16>
    %cst_17 = arith.constant dense<0.000000e+00> : vector<8x128xf32>
    %28 = tpu.matmul %27, %8, %cst_17 {dimension_numbers = #tpu.dot_dimension_numbers<[1], [0], [0], [1], [0, 0, 1, 1], [], []>} : vector<8x256xbf16>, vector<256x128xbf16>, vector<8x128xf32> -> vector<8x128xf32>
    %29 = arith.addf %6, %28 : vector<8x128xf32>
    %30 = arith.truncf %29 : vector<8x128xf32> to vector<8x128xbf16>
    %cst_18 = arith.constant dense<0.000000e+00> : vector<8x256xf32>
    %31 = tpu.matmul %30, %9, %cst_18 {dimension_numbers = #tpu.dot_dimension_numbers<[1], [0], [0], [1], [0, 0, 1, 1], [], []>} : vector<8x128xbf16>, vector<128x256xbf16>, vector<8x256xf32> -> vector<8x256xf32>
    %32 = arith.addf %26, %31 : vector<8x256xf32>
    %33 = arith.addf %32, %12 : vector<8x256xf32>
    %c0_19 = arith.constant 0 : index
    %c0_20 = arith.constant 0 : index
    %34 = vector.load %arg8[%c0_19, %c0_20] : memref<8x256xf32, #tpu.memory_space<vmem>>, vector<8x256xf32>
    tpu.vector_store %arg8[%c0_19, %c0_20], %33 {strides = array<i32>} : memref<8x256xf32, #tpu.memory_space<vmem>>, vector<8x256xf32>,
    return
  }
  func.func @transform_0(%arg0: i32) -> (i32, i32) {
    %c0_i32 = arith.constant 0 : i32
    %c0_i32_0 = arith.constant 0 : i32
    return %arg0, %c0_i32 : i32, i32
  }
  func.func @transform_1(%arg0: i32) -> (i32, i32) {
    %c0_i32 = arith.constant 0 : i32
    %c0_i32_0 = arith.constant 0 : i32
    return %arg0, %c0_i32 : i32, i32
  }
  func.func @transform_2(%arg0: i32) -> (i32, i32) {
    %c0_i32 = arith.constant 0 : i32
    %c0_i32_0 = arith.constant 0 : i32
    %c0_i32_1 = arith.constant 0 : i32
    return %c0_i32, %c0_i32_0 : i32, i32
  }
  func.func @transform_3(%arg0: i32) -> (i32, i32) {
    %c0_i32 = arith.constant 0 : i32
    %c0_i32_0 = arith.constant 0 : i32
    %c0_i32_1 = arith.constant 0 : i32
    return %c0_i32, %c0_i32_0 : i32, i32
  }
  func.func @transform_4(%arg0: i32) -> (i32, i32) {
    %c0_i32 = arith.constant 0 : i32
    %c0_i32_0 = arith.constant 0 : i32
    %c0_i32_1 = arith.constant 0 : i32
    return %c0_i32, %c0_i32_0 : i32, i32
  }
  func.func @transform_5(%arg0: i32) -> (i32, i32) {
    %c0_i32 = arith.constant 0 : i32
    %c0_i32_0 = arith.constant 0 : i32
    %c0_i32_1 = arith.constant 0 : i32
    return %c0_i32, %c0_i32_0 : i32, i32
  }
  func.func @transform_6(%arg0: i32) -> (i32, i32) {
    %c0_i32 = arith.constant 0 : i32
    %c0_i32_0 = arith.constant 0 : i32
    %c0_i32_1 = arith.constant 0 : i32
    return %c0_i32, %c0_i32_0 : i32, i32
  }
  func.func @transform_7(%arg0: i32) -> (i32, i32) {
    %c0_i32 = arith.constant 0 : i32
    %c0_i32_0 = arith.constant 0 : i32
    return %arg0, %c0_i32 : i32, i32
  }
}

</mosaic_0001>

<bundles_post_ra>
// kernel: tpu_custom_call.1
= control target key start
LH: loop header
LB: loop body
LE: loop exit
PB: predicated region body
PF: predicated region fallthrough
CT: control target
= control target key end

     0   :  { %12 = vsyncpa [#allocation3], 0  ;;  %s1318_s0 = inlined_call_operand.hbm [shape: f32[8,256], index: 0, kind: input, shape index: {}]   ;;  %s1319_s1 = inlined_call_operand.hbm [shape: f32[8,256], index: 1, kind: input, shape index: {}]   ;;  %s1320_s2 = inlined_call_operand.hbm [shape: bf16[256,128], index: 2, kind: input, shape index: {}]   ;;  %s1321_s3 = inlined_call_operand.hbm [shape: bf16[256,128], index: 3, kind: input, shape index: {}]   ;;  %s1322_s4 = inlined_call_operand.vmem [shape: f32[1,128], index: 4, kind: input, shape index: {}]   ;;  %s1323_s5 = inlined_call_operand.hbm [shape: bf16[128,256], index: 5, kind: input, shape index: {}]   ;;  %s1324_s6 = inlined_call_operand.vmem [shape: f32[1,256], index: 6, kind: input, shape index: {}]   ;;  %s1325_s7 = inlined_call_operand.hbm [shape: f32[8,256], index: 7, kind: output, shape index: {}]  }
   0x1   :  { %13 = vsyncpa [#allocation6], 0 }
   0x2   :  { %14 = vsyncpa [#allocation9], 0  ;;  %s32_s26 = sshll.u32 %s1319_s1, 4  ;;  %s33_s26 = int_to_ptr.hbm [resolvable:$true] %s32_s26 }
   0x3   :  { %15 = vsyncpa [#allocation4], 0  ;;  %s1099_s27 = smov [#allocation5]   ;;  %s55_s8 = sshll.u32 %s1321_s3, 4  ;;  %s56_s8 = int_to_ptr.hbm [resolvable:$true] %s55_s8 }
   0x4   :  { %s34_s28 = sshll.u32 %s1099_s27, 4  ;;  %s1100_s9 = smov [#allocation8]   ;;  %s35_s28 = int_to_ptr.vmem [resolvable:$true] %s34_s28 }
   0x5   :  { %37 = dma.hbm_to_vmem [thread:$0]  %s33_s26, 256, %s35_s28, [#allocation6]  }
   0x6   :  { %s57_s10 = sshll.u32 %s1100_s9, 4  ;;  %s21_s13 = sshll.u32 %s1318_s0, 4  ;;  %s58_s10 = int_to_ptr.vmem [resolvable:$true] %s57_s10  ;;  %s22_s13 = int_to_ptr.hbm [resolvable:$true] %s21_s13 }
   0x7   :  { %s1101_s1 = smov 64   ;;  %s1102_s14 = smov 4  }
   0x8   :  { %63 = dma.hbm_to_vmem [thread:$0]  %s56_s8, 2048, %s58_s10, [#allocation9], %s1101_s1, %s1101_s1, %s1102_s14  }
   0x9   :  { %s42_s17 = sshll.u32 %s1320_s2, 4  ;;  %s1103_s18 = smov [#allocation2]   ;;  %s43_s17 = int_to_ptr.hbm [resolvable:$true] %s42_s17 }
   0xa   :  { %s23_s19 = sshll.u32 %s1103_s18, 4  ;;  %s1104_s3 = smov [#allocation7]   ;;  %s24_s19 = int_to_ptr.vmem [resolvable:$true] %s23_s19 }
   0xb   :  { %26 = dma.hbm_to_vmem [thread:$0]  %s22_s13, 256, %s24_s19, [#allocation3]  }
   0xc   :  { %s44_s20 = sshll.u32 %s1104_s3, 4  ;;  %s70_s0 = sshll.u32 %s1323_s5, 4  ;;  %s45_s20 = int_to_ptr.vmem [resolvable:$true] %s44_s20  ;;  %s71_s0 = int_to_ptr.hbm [resolvable:$true] %s70_s0 }
   0xd   :  { %50 = dma.hbm_to_vmem [thread:$0]  %s43_s17, 2048, %s45_s20, [#allocation6], %s1101_s1, %s1101_s1, %s1102_s14  }
   0xe   :  { %s1105_s23 = smov [#allocation10]   ;;  %s1106_s25 = smov 128  }
   0xf   :  { %s72_s24 = sshll.u32 %s1105_s23, 4  ;;  %s1107_s26 = smov 8   ;;  %s73_s24 = int_to_ptr.vmem [resolvable:$true] %s72_s24 }
  0x10   :  { %78 = dma.hbm_to_vmem [thread:$0]  %s71_s0, 2048, %s73_s24, [#allocation9], %s1106_s25, %s1106_s25, %s1107_s26  }
  0x11   :  { %1091 = dma.done.wait [#allocation3], 256  }
  0x12   :  { %1092 = vsyncadd [#allocation3], 4294967040 }
  0x13   :  { %1093 = dma.done.wait [#allocation6], 2304  }
  0x14   :  { %1094 = vsyncadd [#allocation6], 4294964992 }
  0x15   :  { %1095 = dma.done.wait [#allocation9], 4096  }
  0x16   :  { %1096 = vsyncadd [#allocation9], 4294963200  ;;  %v895_v0 = vld [vmem:[#allocation7 + $0x38] sm:$0xff]  ;;  %v894_v4 = vld [vmem:[#allocation7 + $0x30] sm:$0xff]  ;;  %s684_s8 = sshll.u32 %s1325_s7, 4  ;;  %s685_s8 = int_to_ptr.hbm [resolvable:$true] %s684_s8 }
  0x17   :  { %v903_v1 = vld [vmem:[#allocation7 + $0x78] sm:$0xff]  ;;  %237 = vmatpush.bf16.msra.mxu0 %v895_v0  ;;  %v902_v5 = vld [vmem:[#allocation7 + $0x70] sm:$0xff]  ;;  %v893_v8 = vld [vmem:[#allocation7 + $0x28] sm:$0xff] }
  0x18   :  { %v1164_v2 = vld [vmem:[#allocation8 + $0x38] sm:$0xff]  ;;  %250 = vmatpush.bf16.msra.mxu1 %v903_v1  ;;  %v1170_v6 = vld [vmem:[#allocation8 + $0x30] sm:$0xff]  ;;  %v901_v9 = vld [vmem:[#allocation7 + $0x68] sm:$0xff] }
  0x19   :  { %v1166_v3 = vld [vmem:[#allocation8 + $0x78] sm:$0xff]  ;;  %417 = vmatpush.bf16.msra.mxu2 %v1164_v2  ;;  %v1172_v7 = vld [vmem:[#allocation8 + $0x70] sm:$0xff]  ;;  %v1176_v10 = vld [vmem:[#allocation8 + $0x28] sm:$0xff] }
  0x1a   :  { %430 = vmatpush.bf16.msra.mxu3 %v1166_v3  ;;  %v1178_v11 = vld [vmem:[#allocation8 + $0x68] sm:$0xff]  ;;  %v892_v12 = vld [vmem:[#allocation7 + $0x20] sm:$0xff]  ;;  %v891_v16 = vld [vmem:[#allocation7 + $0x18] sm:$0xff] }
  0x1b   :  { %238 = vmatpush.bf16.msra.mxu0 %v894_v4  ;;  %v900_v13 = vld [vmem:[#allocation7 + $0x60] sm:$0xff]  ;;  %v899_v17 = vld [vmem:[#allocation7 + $0x58] sm:$0xff]  ;;  %v890_v20 = vld [vmem:[#allocation7 + $0x10] sm:$0xff] }
  0x1c   :  { %251 = vmatpush.bf16.msra.mxu1 %v902_v5  ;;  %v1182_v14 = vld [vmem:[#allocation8 + $0x20] sm:$0xff]  ;;  %v1188_v18 = vld [vmem:[#allocation8 + $0x18] sm:$0xff]  ;;  %v898_v21 = vld [vmem:[#allocation7 + $0x50] sm:$0xff] }
  0x1d   :  { %418 = vmatpush.bf16.msra.mxu2 %v1170_v6  ;;  %v1184_v15 = vld [vmem:[#allocation8 + $0x60] sm:$0xff]  ;;  %v1190_v19 = vld [vmem:[#allocation8 + $0x58] sm:$0xff]  ;;  %v1194_v22 = vld [vmem:[#allocation8 + $0x10] sm:$0xff] }
  0x1e   :  { %431 = vmatpush.bf16.msra.mxu3 %v1172_v7  ;;  %v1196_v23 = vld [vmem:[#allocation8 + $0x50] sm:$0xff]  ;;  %v889_v24 = vld [vmem:[#allocation7 + $0x8] sm:$0xff]  ;;  %v888_v28 = vld [vmem:[#allocation7] sm:$0xff] }
  0x1f   :  { %239 = vmatpush.bf16.msra.mxu0 %v893_v8  ;;  %v897_v25 = vld [vmem:[#allocation7 + $0x48] sm:$0xff]  ;;  %v896_v29 = vld [vmem:[#allocation7 + $0x40] sm:$0xff]  ;;  %v882_v30 = vld [vmem:[#allocation10 + $0x70] sm:$0xf] }
  0x20   :  { %252 = vmatpush.bf16.msra.mxu1 %v901_v9  ;;  %v1200_v26 = vld [vmem:[#allocation8 + $0x8] sm:$0xff]  ;;  %v935_v31 = vld [vmem:[#allocation10 + $0x74] sm:$0xf0]  ;;  %v934_v32 = vld [vmem:[#allocation10 + $0x74] sm:$0xf] }
  0x21   :  { %419 = vmatpush.bf16.msra.mxu2 %v1176_v10  ;;  %v1202_v27 = vld [vmem:[#allocation8 + $0x48] sm:$0xff]  ;;  %v884_v33 = vld [vmem:[#allocation10 + $0x78] sm:$0xf0]  ;;  %v1204_v34 = vld [vmem:[#allocation8] sm:$0xff]  ;;  %v1214_v40 = vor.u32 %v935_v31, %v882_v30 }
  0x22   :  { %432 = vmatpush.bf16.msra.mxu3 %v1178_v11  ;;  %v101_v35 = vld [vmem:[#allocation2] sm:$0xff]  ;;  %v102_v36 = vld [vmem:[#allocation2 + $0x8] sm:$0xff]  ;;  %v1210_v38 = vld [vmem:[#allocation5] sm:$0xff]  ;;  %v1216_v41 = vor.u32 %v934_v32, %v884_v33 }
  0x23   :  { %240 = vmatpush.bf16.msra.mxu0 %v892_v12  ;;  %v1208_v37 = vld [vmem:[#allocation8 + $0x40] sm:$0xff]  ;;  %v1212_v39 = vld [vmem:[#allocation5 + $0x8] sm:$0xff]  ;;  %v103_v43 = vpack.c.bf16 %v101_v35, %v101_v35  ;;  %v104_v44 = vpack.c.bf16 %v102_v36, %v102_v36  ;;  %v933_v45 = vld [vmem:[#allocation10 + $0x64] sm:$0xf0]  ;;  %v319_v48 = vpack.c.bf16 %v1210_v38, %v1210_v38 }
  0x24   :  { %253 = vmatpush.bf16.msra.mxu1 %v900_v13  ;;  %v874_v42 = vld [vmem:[#allocation10 + $0x60] sm:$0xf]  ;;  %v932_v46 = vld [vmem:[#allocation10 + $0x64] sm:$0xf]  ;;  %v876_v47 = vld [vmem:[#allocation10 + $0x68] sm:$0xf0]  ;;  %v320_v49 = vpack.c.bf16 %v1212_v39, %v1212_v39 }
  0x25   :  { %420 = vmatpush.bf16.msra.mxu2 %v1182_v14  ;;  %v1226_v50 = vor.u32 %v933_v45, %v874_v42  ;;  %v1228_v51 = vor.u32 %v932_v46, %v876_v47  ;;  %v866_v52 = vld [vmem:[#allocation10 + $0x50] sm:$0xf]  ;;  %v931_v53 = vld [vmem:[#allocation10 + $0x54] sm:$0xf0]  ;;  %v930_v54 = vld [vmem:[#allocation10 + $0x54] sm:$0xf] }
  0x26   :  { %433 = vmatpush.bf16.msra.mxu3 %v1184_v15  ;;  %v868_v55 = vld [vmem:[#allocation10 + $0x58] sm:$0xf0]  ;;  %v1234_v56 = vor.u32 %v931_v53, %v866_v52  ;;  %v858_v58 = vld [vmem:[#allocation10 + $0x40] sm:$0xf]  ;;  %v929_v59 = vld [vmem:[#allocation10 + $0x44] sm:$0xf0] }
  0x27   :  { %241 = vmatpush.bf16.msra.mxu0 %v891_v16  ;;  %v1236_v57 = vor.u32 %v930_v54, %v868_v55  ;;  %v928_v60 = vld [vmem:[#allocation10 + $0x44] sm:$0xf]  ;;  %v860_v61 = vld [vmem:[#allocation10 + $0x48] sm:$0xf0]  ;;  %v1242_v62 = vor.u32 %v929_v59, %v858_v58  ;;  %v850_v0 = vld [vmem:[#allocation10 + $0x30] sm:$0xf] }
  0x28   :  { %254 = vmatpush.bf16.msra.mxu1 %v899_v17  ;;  %v1244_v63 = vor.u32 %v928_v60, %v860_v61  ;;  %v927_v1 = vld [vmem:[#allocation10 + $0x34] sm:$0xf0]  ;;  %v926_v4 = vld [vmem:[#allocation10 + $0x34] sm:$0xf]  ;;  %v852_v5 = vld [vmem:[#allocation10 + $0x38] sm:$0xf0] }
  0x29   :  { %421 = vmatpush.bf16.msra.mxu2 %v1188_v18  ;;  %v1250_v8 = vor.u32 %v927_v1, %v850_v0  ;;  %v1252_v9 = vor.u32 %v926_v4, %v852_v5  ;;  %v834_v12 = vld [vmem:[#allocation10 + $0x10] sm:$0xf]  ;;  %v923_v13 = vld [vmem:[#allocation10 + $0x14] sm:$0xf0]  ;;  %v836_v16 = vld [vmem:[#allocation10 + $0x18] sm:$0xf0] }
  0x2a   :  { %434 = vmatpush.bf16.msra.mxu3 %v1190_v19 }
  0x2b   :  { %242 = vmatpush.bf16.msra.mxu0 %v890_v20  ;;  %v920_v20 = vld [vmem:[#allocation10 + $0x4] sm:$0xf] }
  0x2c   :  { %255 = vmatpush.bf16.msra.mxu1 %v898_v21 }
  0x2d   :  { %422 = vmatpush.bf16.msra.mxu2 %v1194_v22 }
  0x2e   :  { %435 = vmatpush.bf16.msra.mxu3 %v1196_v23 }
  0x2f   :  { %243 = vmatpush.bf16.msra.mxu0 %v889_v24  ;;  %v946_v24 = vld [vmem:[%s1322_s4] ss:$0 sm:$0xff] }
  0x30   :  { %256 = vmatpush.bf16.msra.mxu1 %v897_v25 }
  0x31   :  { %423 = vmatpush.bf16.msra.mxu2 %v1200_v26 }
  0x32   :  { %436 = vmatpush.bf16.msra.mxu3 %v1202_v27 }
  0x33   :  { %244 = vmatpush.bf16.msra.mxu0 %v888_v28 }
  0x34   :  { %257 = vmatpush.bf16.msra.mxu1 %v896_v29 }
  0x35   :  { %424 = vmatpush.bf16.msra.mxu2 %v1204_v34 }
  0x36   :  { %437 = vmatpush.bf16.msra.mxu3 %v1208_v37  ;;  %245 = vmatmul.bf16.vlgmr.msra.gmra.mxu0 %v103_v43 }
  0x37   :  { %525 = vmatpush.bf16.msrb.mxu0 %v1214_v40  ;;  %258 = vmatmul.bf16.vlgmr.msra.gmra.mxu1 %v104_v44 }
  0x38   :  { %538 = vmatpush.bf16.msrb.mxu1 %v1216_v41  ;;  %425 = vmatmul.bf16.vlgmr.msra.gmra.mxu2 %v319_v48 }
  0x39   :  { %438 = vmatmul.bf16.vlgmr.msra.gmra.mxu3 %v320_v49  ;;  %557 = vmatpush.bf16.msrb.mxu2 %v1164_v2 }
  0x3a   :  { %570 = vmatpush.bf16.msrb.mxu3 %v1166_v3 }
  0x3b   :  { %526 = vmatpush.bf16.msrb.mxu0 %v1226_v50 }
  0x3c   :  { %539 = vmatpush.bf16.msrb.mxu1 %v1228_v51 }
  0x3d   :  { %558 = vmatpush.bf16.msrb.mxu2 %v1170_v6 }
  0x3e   :  { %571 = vmatpush.bf16.msrb.mxu3 %v1172_v7 }
  0x3f   :  { %527 = vmatpush.bf16.msrb.mxu0 %v1234_v56 }
  0x40   :  { %540 = vmatpush.bf16.msrb.mxu1 %v1236_v57 }
  0x41   :  { %559 = vmatpush.bf16.msrb.mxu2 %v1176_v10 }
  0x42   :  { %572 = vmatpush.bf16.msrb.mxu3 %v1178_v11 }
  0x43   :  { %528 = vmatpush.bf16.msrb.mxu0 %v1242_v62 }
  0x44   :  { %541 = vmatpush.bf16.msrb.mxu1 %v1244_v63 }
  0x45   :  { %560 = vmatpush.bf16.msrb.mxu2 %v1182_v14 }
  0x46   :  { %573 = vmatpush.bf16.msrb.mxu3 %v1184_v15 }
  0x47   :  { %529 = vmatpush.bf16.msrb.mxu0 %v1250_v8 }
  0x48   :  { %542 = vmatpush.bf16.msrb.mxu1 %v1252_v9 }
  0x49   :  { %561 = vmatpush.bf16.msrb.mxu2 %v1188_v18 }
  0x4a   :  { %574 = vmatpush.bf16.msrb.mxu3 %v1190_v19 }
  0x4d   :  { %562 = vmatpush.bf16.msrb.mxu2 %v1194_v22 }
  0x4e   :  { %575 = vmatpush.bf16.msrb.mxu3 %v1196_v23 }
  0x51   :  { %563 = vmatpush.bf16.msrb.mxu2 %v1200_v26 }
  0x52   :  { %576 = vmatpush.bf16.msrb.mxu3 %v1202_v27 }
  0x55   :  { %564 = vmatpush.bf16.msrb.mxu2 %v1204_v34 }
  0x56   :  { %577 = vmatpush.bf16.msrb.mxu3 %v1208_v37 }
  0x59   :  { %617 = vmatpush.bf16.msra.mxu2 %v1164_v2  ;;  %v842_v2 = vld [vmem:[#allocation10 + $0x20] sm:$0xf] }
  0x5a   :  { %630 = vmatpush.bf16.msra.mxu3 %v1166_v3  ;;  %v925_v3 = vld [vmem:[#allocation10 + $0x24] sm:$0xf0] }
  0x5d   :  { %618 = vmatpush.bf16.msra.mxu2 %v1170_v6  ;;  %v924_v6 = vld [vmem:[#allocation10 + $0x24] sm:$0xf] }
  0x5e   :  { %631 = vmatpush.bf16.msra.mxu3 %v1172_v7  ;;  %v843_v7 = vor.u32 %v925_v3, %v842_v2 }
  0x60   :  { %530 = vmatpush.bf16.msrb.mxu0 %v843_v7 }
  0x61   :  { %619 = vmatpush.bf16.msra.mxu2 %v1176_v10  ;;  %v844_v10 = vld [vmem:[#allocation10 + $0x28] sm:$0xf0] }
  0x62   :  { %632 = vmatpush.bf16.msra.mxu3 %v1178_v11  ;;  %v847_v11 = vor.u32 %v924_v6, %v844_v10 }
  0x64   :  { %543 = vmatpush.bf16.msrb.mxu1 %v847_v11 }
  0x65   :  { %620 = vmatpush.bf16.msra.mxu2 %v1182_v14  ;;  %v922_v14 = vld [vmem:[#allocation10 + $0x14] sm:$0xf] }
  0x66   :  { %633 = vmatpush.bf16.msra.mxu3 %v1184_v15  ;;  %v835_v15 = vor.u32 %v923_v13, %v834_v12  ;;  %v839_v17 = vor.u32 %v922_v14, %v836_v16 }
  0x68   :  { %531 = vmatpush.bf16.msrb.mxu0 %v835_v15  ;;  %544 = vmatpush.bf16.msrb.mxu1 %v839_v17 }
  0x69   :  { %621 = vmatpush.bf16.msra.mxu2 %v1188_v18  ;;  %v826_v18 = vld [vmem:[#allocation10] sm:$0xf] }
  0x6a   :  { %634 = vmatpush.bf16.msra.mxu3 %v1190_v19  ;;  %v921_v19 = vld [vmem:[#allocation10 + $0x4] sm:$0xf0] }
  0x6b   :  { %v827_v21 = vor.u32 %v921_v19, %v826_v18 }
  0x6d   :  { %622 = vmatpush.bf16.msra.mxu2 %v1194_v22  ;;  %v828_v22 = vld [vmem:[#allocation10 + $0x8] sm:$0xf0]  ;;  %532 = vmatpush.bf16.msrb.mxu0 %v827_v21 }
  0x6e   :  { %635 = vmatpush.bf16.msra.mxu3 %v1196_v23  ;;  %v831_v23 = vor.u32 %v920_v20, %v828_v22 }
  0x70   :  { %545 = vmatpush.bf16.msrb.mxu1 %v831_v23 }
  0x71   :  { %623 = vmatpush.bf16.msra.mxu2 %v1200_v26  ;;  %585 = vmatpush.bf16.msra.mxu0 %v1214_v40 }
  0x72   :  { %636 = vmatpush.bf16.msra.mxu3 %v1202_v27 }
  0x74   :  { %598 = vmatpush.bf16.msra.mxu1 %v1216_v41 }
  0x75   :  { %624 = vmatpush.bf16.msra.mxu2 %v1204_v34  ;;  %586 = vmatpush.bf16.msra.mxu0 %v1226_v50 }
  0x76   :  { %637 = vmatpush.bf16.msra.mxu3 %v1208_v37 }
  0x78   :  { %599 = vmatpush.bf16.msra.mxu1 %v1228_v51 }
  0x79   :  { %587 = vmatpush.bf16.msra.mxu0 %v1234_v56 }
  0x7c   :  { %600 = vmatpush.bf16.msra.mxu1 %v1236_v57 }
  0x7d   :  { %588 = vmatpush.bf16.msra.mxu0 %v1242_v62 }
  0x80   :  { %601 = vmatpush.bf16.msra.mxu1 %v1244_v63 }
  0x81   :  { %589 = vmatpush.bf16.msra.mxu0 %v1250_v8 }
  0x84   :  { %602 = vmatpush.bf16.msra.mxu1 %v1252_v9 }
  0x85   :  { %590 = vmatpush.bf16.msra.mxu0 %v843_v7 }
  0x88   :  { %603 = vmatpush.bf16.msra.mxu1 %v847_v11 }
  0x89   :  { %591 = vmatpush.bf16.msra.mxu0 %v835_v15 }
  0x8c   :  { %604 = vmatpush.bf16.msra.mxu1 %v839_v17 }
  0x8d   :  { %592 = vmatpush.bf16.msra.mxu0 %v827_v21 }
  0x90   :  { %605 = vmatpush.bf16.msra.mxu1 %v831_v23 }
  0xb3   :  { %v246_v25 = vpop.f32.mrf.mxu0 }
  0xb4   :  { %v259_v26 = vpop.f32.mrf.mxu1  ;;  %v247_v27 = vadd.f32 %v946_v24, %v246_v25 }
  0xb6   :  { %v1295_v28 = vadd.f32 %v259_v26, %v247_v27 }
  0xbb   :  { %v426_v29 = vpop.f32.mrf.mxu2  ;;  %v248_v32 = vpop.f32.mrf.mxu0 }
  0xbc   :  { %v439_v30 = vpop.f32.mrf.mxu3  ;;  %v261_v33 = vpop.f32.mrf.mxu1 }
  0xbd   :  { %v440_v31 = vadd.f32 %v439_v30, %v426_v29 }
  0xbf   :  { %v443_v34 = vadd.f32 %v440_v31, %v1295_v28 }
  0xc1   :  { %v444_v35 = vpack.c.bf16 %v443_v34, %v443_v34 }
  0xc3   :  { %533 = vmatmul.bf16.vlgmr.msrb.gmra.mxu0 %v444_v35  ;;  %546 = vmatmul.bf16.vlgmr.msrb.gmra.mxu1 %v444_v35  ;;  %v428_v36 = vpop.f32.mrf.mxu2 }
  0xc4   :  { %v441_v37 = vpop.f32.mrf.mxu3  ;;  %645 = vmatpush.bf16.msrb.mxu0 %v1214_v40  ;;  %658 = vmatpush.bf16.msrb.mxu1 %v1216_v41  ;;  %v313_v40 = vld [vmem:[%s1324_s6] sm:$0x3]  ;;  %s1108_s6 = smov [#allocation11]  }
  0xc5   :  { %v315_v41 = vperm.slane %v313_v40, 0  ;;  %v316_v42 = vperm.slane %v313_v40, 1  ;;  %s682_s28 = sshll.u32 %s1108_s6, 4  ;;  %s683_s28 = int_to_ptr.vmem [resolvable:$true] %s682_s28 }
  0xc8   :  { %646 = vmatpush.bf16.msrb.mxu0 %v1226_v50  ;;  %659 = vmatpush.bf16.msrb.mxu1 %v1228_v51 }
  0xcc   :  { %647 = vmatpush.bf16.msrb.mxu0 %v1234_v56  ;;  %660 = vmatpush.bf16.msrb.mxu1 %v1236_v57 }
  0xd0   :  { %648 = vmatpush.bf16.msrb.mxu0 %v1242_v62  ;;  %661 = vmatpush.bf16.msrb.mxu1 %v1244_v63 }
  0xd4   :  { %649 = vmatpush.bf16.msrb.mxu0 %v1250_v8  ;;  %662 = vmatpush.bf16.msrb.mxu1 %v1252_v9 }
  0xd8   :  { %650 = vmatpush.bf16.msrb.mxu0 %v843_v7  ;;  %663 = vmatpush.bf16.msrb.mxu1 %v847_v11 }
  0xdc   :  { %651 = vmatpush.bf16.msrb.mxu0 %v835_v15  ;;  %664 = vmatpush.bf16.msrb.mxu1 %v839_v17 }
  0xe0   :  { %652 = vmatpush.bf16.msrb.mxu0 %v827_v21  ;;  %665 = vmatpush.bf16.msrb.mxu1 %v831_v23 }
 0x140   :  { %v534_v43 = vpop.f32.mrf.mxu0  ;;  %v547_v44 = vpop.f32.mrf.mxu1 }
 0x141   :  { %v551_v45 = vadd.f32 %v534_v43, %v1210_v38  ;;  %v552_v46 = vadd.f32 %v547_v44, %v1212_v39 }
 0x143   :  { %v553_v47 = vadd.f32 %v551_v45, %v315_v41  ;;  %v554_v48 = vadd.f32 %v552_v46, %v316_v42 }
 0x145   :  { %v555_v49 = vpack.c.bf16 %v553_v47, %v553_v47  ;;  %v556_v50 = vpack.c.bf16 %v554_v48, %v554_v48 }
 0x147   :  { %565 = vmatmul.bf16.vlgmr.msrb.gmra.mxu2 %v555_v49  ;;  %578 = vmatmul.bf16.vlgmr.msrb.gmra.mxu3 %v556_v50 }
 0x148   :  { %v536_v51 = vpop.f32.mrf.mxu0  ;;  %v549_v52 = vpop.f32.mrf.mxu1 }
 0x1ca   :  { %v566_v53 = vpop.f32.mrf.mxu2  ;;  %v579_v54 = vpop.f32.mrf.mxu3 }
 0x1cb   :  { %v580_v55 = vadd.f32 %v579_v54, %v566_v53 }
 0x1cd   :  { %v583_v56 = vadd.f32 %v580_v55, %v1295_v28 }
 0x1cf   :  { %v584_v57 = vpack.c.bf16 %v583_v56, %v583_v56 }
 0x1d1   :  { %593 = vmatmul.bf16.vlgmr.msra.gmra.mxu0 %v584_v57  ;;  %606 = vmatmul.bf16.vlgmr.msra.gmra.mxu1 %v584_v57 }
 0x1d2   :  { %v568_v58 = vpop.f32.mrf.mxu2  ;;  %v581_v38 = vpop.f32.mrf.mxu3 }
 0x24e   :  { %v594_v59 = vpop.f32.mrf.mxu0  ;;  %v607_v39 = vpop.f32.mrf.mxu1 }
 0x24f   :  { %v611_v60 = vadd.f32 %v594_v59, %v553_v47  ;;  %v612_v61 = vadd.f32 %v607_v39, %v554_v48 }
 0x251   :  { %v613_v62 = vadd.f32 %v611_v60, %v315_v41  ;;  %v614_v63 = vadd.f32 %v612_v61, %v316_v42 }
 0x253   :  { %v615_v0 = vpack.c.bf16 %v613_v62, %v613_v62  ;;  %v616_v1 = vpack.c.bf16 %v614_v63, %v614_v63 }
 0x255   :  { %625 = vmatmul.bf16.vlgmr.msra.gmra.mxu2 %v615_v0  ;;  %638 = vmatmul.bf16.vlgmr.msra.gmra.mxu3 %v616_v1 }
 0x256   :  { %v596_v4 = vpop.f32.mrf.mxu0  ;;  %v609_v5 = vpop.f32.mrf.mxu1 }
 0x2d8   :  { %v626_v8 = vpop.f32.mrf.mxu2  ;;  %v639_v9 = vpop.f32.mrf.mxu3 }
 0x2d9   :  { %v640_v2 = vadd.f32 %v639_v9, %v626_v8 }
 0x2db   :  { %v643_v3 = vadd.f32 %v640_v2, %v1295_v28 }
 0x2dd   :  { %v644_v6 = vpack.c.bf16 %v643_v3, %v643_v3 }
 0x2df   :  { %653 = vmatmul.bf16.vlgmr.msrb.gmra.mxu0 %v644_v6  ;;  %666 = vmatmul.bf16.vlgmr.msrb.gmra.mxu1 %v644_v6 }
 0x2e0   :  { %v628_v7 = vpop.f32.mrf.mxu2  ;;  %v641_v10 = vpop.f32.mrf.mxu3 }
 0x35c   :  { %v654_v11 = vpop.f32.mrf.mxu0  ;;  %v667_v12 = vpop.f32.mrf.mxu1 }
 0x35d   :  { %v671_v13 = vadd.f32 %v654_v11, %v613_v62  ;;  %v672_v14 = vadd.f32 %v667_v12, %v614_v63 }
 0x35f   :  { %v673_v15 = vadd.f32 %v671_v13, %v315_v41  ;;  %v674_v16 = vadd.f32 %v672_v14, %v316_v42 }
 0x361   :  { %675 = vst [vmem:[#allocation11] sm:$0xff] %v673_v15 }
 0x362   :  { %676 = vst [vmem:[#allocation11 + $0x8] sm:$0xff] %v674_v16 }
 0x363   :  { %687 = dma.vmem_to_hbm [thread:$0]  %s683_s28, 256, %s685_s8, [#allocation4]  }
 0x364   :  { %v656_v17 = vpop.f32.mrf.mxu0  ;;  %v669_v18 = vpop.f32.mrf.mxu1 }
 0x365   :  { %1097 = dma.done.wait [#allocation4], 256  }
 0x366   :  { %1098 = vsyncadd [#allocation4], 4294967040 }
 0x367   :  { %692 = vsyncpa [#allocation3], 1 }
 0x368   :  { %693 = vsyncpa [#allocation6], 1 }
 0x369   :  { %694 = vsyncpa [#allocation9], 1 }
 0x36a   :  { %695 = vsyncpa [#allocation4], 1 }

</bundles_post_ra>
